<compile_context>
chip_gen: v6e
topology: v6e:2x2x1
jax: 0.10.0
libtpu: 0.0.40
codegen_flags: <defaults>
</compile_context>

<pallas_src>
import jax
import jax.numpy as jnp
import numpy as np
from jax.experimental import pallas as pl
from jax.experimental.pallas import tpu as pltpu


def _sa_classifier_kernel(x_ref, w_ref, b_ref, out_ref):
    # x_ref  : [M, TB, D]  per-mode activations (native layout, no wrapper transpose)
    # w_ref  : [M, D, D]   per-mode classifier weight blocks W_torch[:, m*D:(m+1)*D].T
    # b_ref  : [1, D]      classifier bias
    # out_ref: [TB, D]     softmax(linear(cat(x)))  — the torch module's return value
    M = x_ref.shape[0]

    # logits = cat(x) @ W.T + b  ==  sum_m x[m] @ W_m + b  (static unroll, M is tiny)
    acc = jnp.dot(x_ref[0].astype(jnp.float32), w_ref[0],
                  preferred_element_type=jnp.float32)
    for m in range(1, M):
        acc = acc + jnp.dot(x_ref[m].astype(jnp.float32), w_ref[m],
                            preferred_element_type=jnp.float32)
    logits = acc + b_ref[...]                              # [TB, D] f32

    # softmax over the feature dim (torch Softmax(dim=1))
    mx = jnp.max(logits, axis=-1, keepdims=True)
    e = jnp.exp(logits - mx)                               # EUP
    denom = jnp.sum(e, axis=-1, keepdims=True)             # XLU lane reduce
    inv = pl.reciprocal(denom, approx=True)                # EUP vrcp (free slot)
    inv = inv * (2.0 - denom * inv)                        # one Newton step -> ~f32 accuracy
    out_ref[...] = (e * inv).astype(out_ref.dtype)


def self_attention_classifier(x, w_att, b_att, W_torch, b_vec, *, block_b=4096):
    """x: [M, B, D] stacked per-mode inputs (input_list[i] is x[i], shape [B, D]).
       w_att: [M, D], b_att: [M]      -- per-mode nn.Linear(D, 1) params (UNUSED: the
                                          torch forward discards the attention outputs).
       W_torch: [D, M*D], b_vec: [D]  -- classifier nn.Linear(M*D, D) (torch layout).
       Returns softmax_result [B, D]  -- exactly what the torch module's forward returns."""
    del w_att, b_att  # attention params do not affect the module's return value
    M, B, D = x.shape
    dt = x.dtype

    # Per-mode weight blocks: w_modes[m] = W_torch[:, m*D:(m+1)*D].T  -> [M, D, D]
    w_modes = W_torch.astype(jnp.float32).reshape(D, M, D).transpose(1, 2, 0)
    b_row = b_vec.astype(jnp.float32).reshape(1, D)

    # Batch tile: multiple of 8 (sublane) or the full batch.
    tb = min(block_b, B)
    if tb != B:
        tb = max(8, (tb // 8) * 8)
    grid = (pl.cdiv(B, tb),)

    grid_spec = pltpu.PrefetchScalarGridSpec(
        num_scalar_prefetch=0,
        grid=grid,
        in_specs=[
            pl.BlockSpec((M, tb, D), lambda i: (0, i, 0)),   # x in native [M,B,D], batch-tiled
            pl.BlockSpec((M, D, D), lambda i: (0, 0, 0)),    # per-mode weights (grid-invariant)
            pl.BlockSpec((1, D), lambda i: (0, 0)),          # bias (grid-invariant)
        ],
        out_specs=pl.BlockSpec((tb, D), lambda i: (i, 0)),   # softmax result
    )

    itemsize = jnp.dtype(dt).itemsize
    flops = 2 * B * M * D * D
    transcendentals = B * (D + 1)
    bytes_accessed = (itemsize * B * M * D          # x
                      + itemsize * B * D            # out
                      + 4 * (M * D * D + D))        # weights + bias

    out = pl.pallas_call(
        _sa_classifier_kernel,
        out_shape=jax.ShapeDtypeStruct((B, D), dt),
        grid_spec=grid_spec,
        compiler_params=pltpu.CompilerParams(
            dimension_semantics=("parallel",),       # dual-TC sharding on v7x, pipelined DMA
            vmem_limit_bytes=32 * 1024 * 1024,       # tiles are tiny; safe on v5e/v6e/v7x
        ),
        cost_estimate=pl.CostEstimate(
            flops=flops,
            transcendentals=transcendentals,
            bytes_accessed=bytes_accessed,
        ),
    )(x, w_modes, b_row)

    return out


def reference(x, w_att, b_att, W_torch, b_vec):
    """Pure-JAX replica of the PyTorch forward (torch weight layout).
       The per-mode SelfAttention outputs are computed-and-discarded by the torch
       forward, so they do not influence the returned value."""
    M = x.shape[0]
    cat = jnp.concatenate([x[m] for m in range(M)], axis=-1)   # torch.cat(dim=1)
    logits = cat @ W_torch.T + b_vec
    return jax.nn.softmax(logits, axis=1)


if __name__ == "__main__":
    modes, batch, modality_size = 2, 256, 32
    M, B, D = modes, batch, modality_size

    key = jax.random.PRNGKey(0)
    k_x, k_wa, k_ba, k_wc, k_bc = jax.random.split(key, 5)

    # inputs: list of `modes` tensors, each [B, D] -> stacked [M, B, D]
    x = jax.random.normal(k_x, (M, B, D), dtype=jnp.float32)

    # per-mode SelfAttention params: nn.Linear(D, 1) -> weight [1, D], bias [1]
    w_att = jax.random.normal(k_wa, (M, D), dtype=jnp.float32) * 0.1
    b_att = jax.random.normal(k_ba, (M,), dtype=jnp.float32) * 0.1

    # classifier: nn.Linear(modes * D, D) -> torch weight [D, modes*D], bias [D]
    W_torch = jax.random.normal(k_wc, (D, M * D), dtype=jnp.float32) * 0.1
    b_vec = jax.random.normal(k_bc, (D,), dtype=jnp.float32) * 0.1

    # block_b=64 -> grid of 4 batch tiles (exercises the pipeline / dual-TC sharding).
    out = self_attention_classifier(x, w_att, b_att, W_torch, b_vec, block_b=64)
    out = jax.block_until_ready(out)

    ref_out = reference(x, w_att, b_att, W_torch, b_vec)
    # out uses the approx-EUP reciprocal (+1 Newton step) -> slightly looser tolerance.
    assert np.allclose(np.asarray(out), np.asarray(ref_out), atol=1e-4, rtol=1e-4)

    print("KERNEL_OK")
</pallas_src>

<mosaic_0001>
module attributes {stable_mosaic.version = 11 : i64} {
  func.func @_sa_classifier_kernel(%arg0: i32, %arg1: memref<2x64x32xf32, #tpu.memory_space<vmem>>, %arg2: memref<2x32x32xf32, #tpu.memory_space<vmem>>, %arg3: memref<1x32xf32, #tpu.memory_space<vmem>>, %arg4: memref<64x32xf32, #tpu.memory_space<vmem>>) attributes {dimension_semantics = [#tpu.dimension_semantics<parallel>], iteration_bounds = array<i64: 4>, scalar_prefetch = 0 : i64, scratch_operands = 0 : i64, tpu.core_type = #tpu.core_type<tc>, window_params = [{transform_indices = @transform_0, window_bounds = array<i64: 2, 64, 32>}, {pipeline_mode = #tpu.pipeline_mode<synchronous>, transform_indices = @transform_1, window_bounds = array<i64: 2, 32, 32>}, {pipeline_mode = #tpu.pipeline_mode<synchronous>, transform_indices = @transform_2, window_bounds = array<i64: 1, 32>}, {transform_indices = @transform_3, window_bounds = array<i64: 64, 32>}]} {
    %c0 = arith.constant 0 : index
    %c0_0 = arith.constant 0 : index
    %c0_1 = arith.constant 0 : index
    %0 = vector.load %arg1[%c0, %c0_0, %c0_1] : memref<2x64x32xf32, #tpu.memory_space<vmem>>, vector<1x64x32xf32>
    %1 = vector.shape_cast %0 : vector<1x64x32xf32> to vector<64x32xf32>
    %c0_2 = arith.constant 0 : index
    %c0_3 = arith.constant 0 : index
    %c0_4 = arith.constant 0 : index
    %2 = vector.load %arg2[%c0_2, %c0_3, %c0_4] : memref<2x32x32xf32, #tpu.memory_space<vmem>>, vector<1x32x32xf32>
    %3 = vector.shape_cast %2 : vector<1x32x32xf32> to vector<32x32xf32>
    %cst = arith.constant dense<0.000000e+00> : vector<64x32xf32>
    %4 = tpu.matmul %1, %3, %cst {dimension_numbers = #tpu.dot_dimension_numbers<[1], [0], [0], [1], [0, 0, 1, 1], [], []>} : vector<64x32xf32>, vector<32x32xf32>, vector<64x32xf32> -> vector<64x32xf32>
    %c1 = arith.constant 1 : index
    %c0_5 = arith.constant 0 : index
    %c0_6 = arith.constant 0 : index
    %5 = vector.load %arg1[%c1, %c0_5, %c0_6] : memref<2x64x32xf32, #tpu.memory_space<vmem>>, vector<1x64x32xf32>
    %6 = vector.shape_cast %5 : vector<1x64x32xf32> to vector<64x32xf32>
    %c1_7 = arith.constant 1 : index
    %c0_8 = arith.constant 0 : index
    %c0_9 = arith.constant 0 : index
    %7 = vector.load %arg2[%c1_7, %c0_8, %c0_9] : memref<2x32x32xf32, #tpu.memory_space<vmem>>, vector<1x32x32xf32>
    %8 = vector.shape_cast %7 : vector<1x32x32xf32> to vector<32x32xf32>
    %cst_10 = arith.constant dense<0.000000e+00> : vector<64x32xf32>
    %9 = tpu.matmul %6, %8, %cst_10 {dimension_numbers = #tpu.dot_dimension_numbers<[1], [0], [0], [1], [0, 0, 1, 1], [], []>} : vector<64x32xf32>, vector<32x32xf32>, vector<64x32xf32> -> vector<64x32xf32>
    %10 = arith.addf %4, %9 : vector<64x32xf32>
    %c0_11 = arith.constant 0 : index
    %c0_12 = arith.constant 0 : index
    %11 = vector.load %arg3[%c0_11, %c0_12] : memref<1x32xf32, #tpu.memory_space<vmem>>, vector<1x32xf32>
    %12 = vector.broadcast %11 : vector<1x32xf32> to vector<64x32xf32>
    %13 = arith.addf %10, %12 : vector<64x32xf32>
    %cst_13 = arith.constant dense<0xFF800000> : vector<64xf32>
    %14 = vector.multi_reduction <maximumf>, %13, %cst_13 [1] : vector<64x32xf32> to vector<64xf32>
    %15 = vector.shape_cast %14 : vector<64xf32> to vector<64x1xf32>
    %16 = vector.broadcast %15 : vector<64x1xf32> to vector<64x32xf32>
    %17 = arith.subf %13, %16 : vector<64x32xf32>
    %18 = math.exp %17 : vector<64x32xf32>
    %cst_14 = arith.constant dense<0.000000e+00> : vector<64xf32>
    %19 = vector.multi_reduction <add>, %18, %cst_14 [1] : vector<64x32xf32> to vector<64xf32>
    %20 = vector.shape_cast %19 : vector<64xf32> to vector<64x1xf32>
    %21 = tpu.reciprocal %20 {approx = true} : vector<64x1xf32> -> vector<64x1xf32>
    %22 = arith.mulf %20, %21 : vector<64x1xf32>
    %cst_15 = arith.constant 2.000000e+00 : f32
    %23 = vector.broadcast %cst_15 : f32 to vector<64x1xf32>
    %24 = arith.subf %23, %22 : vector<64x1xf32>
    %25 = arith.mulf %21, %24 : vector<64x1xf32>
    %26 = vector.broadcast %25 : vector<64x1xf32> to vector<64x32xf32>
    %27 = arith.mulf %18, %26 : vector<64x32xf32>
    %c0_16 = arith.constant 0 : index
    %c0_17 = arith.constant 0 : index
    %28 = vector.load %arg4[%c0_16, %c0_17] : memref<64x32xf32, #tpu.memory_space<vmem>>, vector<64x32xf32>
    tpu.vector_store %arg4[%c0_16, %c0_17], %27 {strides = array<i32>} : memref<64x32xf32, #tpu.memory_space<vmem>>, vector<64x32xf32>,
    return
  }
  func.func @transform_0(%arg0: i32) -> (i32, i32, i32) {
    %c0_i32 = arith.constant 0 : i32
    %c0_i32_0 = arith.constant 0 : i32
    %c0_i32_1 = arith.constant 0 : i32
    return %c0_i32, %arg0, %c0_i32_0 : i32, i32, i32
  }
  func.func @transform_1(%arg0: i32) -> (i32, i32, i32) {
    %c0_i32 = arith.constant 0 : i32
    %c0_i32_0 = arith.constant 0 : i32
    %c0_i32_1 = arith.constant 0 : i32
    %c0_i32_2 = arith.constant 0 : i32
    return %c0_i32, %c0_i32_0, %c0_i32_1 : i32, i32, i32
  }
  func.func @transform_2(%arg0: i32) -> (i32, i32) {
    %c0_i32 = arith.constant 0 : i32
    %c0_i32_0 = arith.constant 0 : i32
    %c0_i32_1 = arith.constant 0 : i32
    return %c0_i32, %c0_i32_0 : i32, i32
  }
  func.func @transform_3(%arg0: i32) -> (i32, i32) {
    %c0_i32 = arith.constant 0 : i32
    %c0_i32_0 = arith.constant 0 : i32
    return %arg0, %c0_i32 : i32, i32
  }
}

</mosaic_0001>

<bundles_post_ra>
// kernel: tpu_custom_call.1
= control target key start
LH: loop header
LB: loop body
LE: loop exit
PB: predicated region body
PF: predicated region fallthrough
CT: control target
= control target key end

     0   :  { %s958_s12 = smov 0   ;;  %s960_s13 = smov 0   ;;  %s1143_s0 = inlined_call_operand.vmem [shape: f32[2,256,32], index: 0, kind: input, shape index: {}]   ;;  %s1144_s1 = inlined_call_operand.vmem [shape: f32[2,32,32], index: 1, kind: input, shape index: {}]   ;;  %s1145_s2 = inlined_call_operand.vmem [shape: f32[1,32], index: 2, kind: input, shape index: {}]   ;;  %s1146_s3 = inlined_call_operand.vmem [shape: f32[256,32], index: 3, kind: output, shape index: {}]  }
   0x1   :  { %s962_s14 = smov 0  }
   0x2 LB: > { %s751_s15 = sadd.s32 4294967295, %s936_s14   ;;  %s975_s16 = sadd.s32 1, %s936_s14   ;;  %s936_s14 = sphi %s962_s14, %s1149_s14   ;;  %s932_s13 = sphi %s960_s13, %s1148_s13   ;;  %s928_s12 = sphi %s958_s12, %s1147_s12  }
   0x3   : > { %s17_s17 = ssub.s32 %s936_s14, %s975_s16  ;;  %s20_s18 = sadd.s32 1, %s932_s13 }
   0x4   : > { %p18_p0 = scmp.eq.s32.totalorder %s17_s17, 0  ;;  %p27_p1 = scmp.ne.s32.totalorder %s932_s13, %s928_s12 }
   0x5   : > { %p28_p2 = scmp.eq.s32.totalorder %s936_s14, 0  ;;  %p754_p4 = scmp.ge.s32.totalorder %s936_s14, 4 }
   0x6   : > { %s984_s19 = scalar_select %p18_p0, %s932_s13, %s20_s18  }
   0x7   : > { %p29_p3 = por %p28_p2, %p27_p1  ;;  %127 = sbr.rel (%p754_p4) target bundleno = 24 (0x18), region = 24 }
   0xc   : > { %130 = sbr.rel (!%p29_p3) target bundleno = 24 (0x18), region = 28  ;;  %s132_s20 = sand.u32 (%p29_p3), 1, %s932_s13  }
   0xd   : > { %s793_s21 = sshll.u32 (%p29_p3), %s936_s14, 6  ;;  %s755_s22 = sshll.u32 (%p29_p3), %s132_s20, 7 }
   0xe   : > { %s992_s25 = scalar_lea.vmem (%p29_p3), %s1143_s0, %s793_s21  ;;  %s134_s26 = scalar_lea.vmem (%p29_p3), [#allocation2], %s755_s22 }
   0xf   : > { %v196_v0 = vld [vmem:[%s992_s25] sm:$0xff] (%p29_p3)  ;;  %v198_v1 = vld [vmem:[%s992_s25 + $0x8] sm:$0xff] (%p29_p3)  ;;  %v200_v2 = vld [vmem:[%s992_s25 + $0x10] sm:$0xff] (%p29_p3) }
  0x10   : > { %197 = vst [vmem:[%s134_s26] sm:$0xff] (%p29_p3), %v196_v0  ;;  %199 = vst [vmem:[%s134_s26 + $0x8] sm:$0xff] (%p29_p3), %v198_v1  ;;  %v202_v3 = vld [vmem:[%s992_s25 + $0x18] sm:$0xff] (%p29_p3)  ;;  %v204_v4 = vld [vmem:[%s992_s25 + $0x20] sm:$0xff] (%p29_p3) }
  0x11   : > { %201 = vst [vmem:[%s134_s26 + $0x10] sm:$0xff] %v200_v2  ;;  %v206_v5 = vld [vmem:[%s992_s25 + $0x28] sm:$0xff]  ;;  %203 = vst [vmem:[%s134_s26 + $0x18] sm:$0xff] %v202_v3  ;;  %v208_v6 = vld [vmem:[%s992_s25 + $0x30] sm:$0xff] }
  0x12   : > { %205 = vst [vmem:[%s134_s26 + $0x20] sm:$0xff] %v204_v4  ;;  %207 = vst [vmem:[%s134_s26 + $0x28] sm:$0xff] %v206_v5  ;;  %v210_v7 = vld [vmem:[%s992_s25 + $0x38] sm:$0xff]  ;;  %v212_v8 = vld [vmem:[%s992_s25 + $0x100] sm:$0xff] }
  0x13   : > { %209 = vst [vmem:[%s134_s26 + $0x30] sm:$0xff] %v208_v6  ;;  %211 = vst [vmem:[%s134_s26 + $0x38] sm:$0xff] %v210_v7  ;;  %v214_v9 = vld [vmem:[%s992_s25 + $0x108] sm:$0xff]  ;;  %v216_v10 = vld [vmem:[%s992_s25 + $0x110] sm:$0xff] }
  0x14   : > { %213 = vst [vmem:[%s134_s26 + $0x40] sm:$0xff] %v212_v8  ;;  %v218_v11 = vld [vmem:[%s992_s25 + $0x118] sm:$0xff]  ;;  %215 = vst [vmem:[%s134_s26 + $0x48] sm:$0xff] %v214_v9  ;;  %v220_v12 = vld [vmem:[%s992_s25 + $0x120] sm:$0xff] }
  0x15   : > { %217 = vst [vmem:[%s134_s26 + $0x50] sm:$0xff] %v216_v10  ;;  %219 = vst [vmem:[%s134_s26 + $0x58] sm:$0xff] %v218_v11  ;;  %v222_v13 = vld [vmem:[%s992_s25 + $0x128] sm:$0xff]  ;;  %v224_v14 = vld [vmem:[%s992_s25 + $0x130] sm:$0xff] }
  0x16   : > { %221 = vst [vmem:[%s134_s26 + $0x60] sm:$0xff] %v220_v12  ;;  %223 = vst [vmem:[%s134_s26 + $0x68] sm:$0xff] %v222_v13  ;;  %v226_v15 = vld [vmem:[%s992_s25 + $0x138] sm:$0xff] }
  0x17   : > { %225 = vst [vmem:[%s134_s26 + $0x70] sm:$0xff] %v224_v14  ;;  %227 = vst [vmem:[%s134_s26 + $0x78] sm:$0xff] %v226_v15 }
  0x18 PF: > { %p758_p5 = scmp.ge.s32.totalorder %s936_s14, 1  ;;  %p232_p6 = scmp.lt.s32.totalorder %s936_s14, 5 }
  0x1a   : > { %p233_p7 = pnand %p758_p5, %p232_p6 }
  0x1b   : > { %s239_s6 = sand.u32 (!%p233_p7), 1, %s928_s12   ;;  %s760_s26 = sshll.u32 (!%p233_p7), %s751_s15, 3 }
  0x1c   : > { %236 = sbr.rel (%p233_p7) target bundleno = 577 (0x241), region = 66  ;;  %s759_s9 = sshll.u32 (!%p233_p7), %s239_s6, 7 }
  0x1d   : > { %s1037_s23 = scalar_lea.vmem (!%p233_p7), [#allocation2], %s759_s9  ;;  %p264_p8 = scmp.lt.s32.totalorder (!%p233_p7), %s760_s26, 31 }
  0x21   : > { %v773_v16 = vld [vmem:[%s1144_s1 + $0x38] sm:$0xff]  ;;  %v772_v18 = vld [vmem:[%s1144_s1 + $0x30] sm:$0xff]  ;;  %v771_v20 = vld [vmem:[%s1144_s1 + $0x28] sm:$0xff]  ;;  %vm295_vm0 = vcmask 261120   ;;  %s1151_s26 = smov (!%p264_p8, %s760_s26), 31 }
  0x22   : > { %v280_v17 = vld [vmem:[%s1144_s1 + $0x18] sm:$0xff]  ;;  %818 = vmatprep.subr.mxu0 %v773_v16  ;;  %v279_v19 = vld [vmem:[%s1144_s1 + $0x10] sm:$0xff]  ;;  %v278_v21 = vld [vmem:[%s1144_s1 + $0x8] sm:$0xff]  ;;  %s761_s27 = sshll.u32 %s1151_s26, 3 }
  0x23   : > { %838 = vmatprep.subr.mxu1 %v280_v17  ;;  %819 = vmatpush3.msra.mxu0 %v773_v16  ;;  %v770_v22 = vld [vmem:[%s1144_s1 + $0x20] sm:$0xff]  ;;  %v763_v26 = vld [vmem:[%s1037_s23 + $0x48] sm:$0xff]  ;;  %v764_v28 = vld [vmem:[%s1037_s23 + $0x50] sm:$0xff]  ;;  %s1110_s28 = scalar_lea.vmem %s1146_s3, %s761_s27 }
  0x24   : > { %839 = vmatpush3.msra.mxu1 %v280_v17  ;;  %820 = vmatprep.subr.mxu0 %v772_v18  ;;  %v277_v23 = vld [vmem:[%s1144_s1] sm:$0xff]  ;;  %v270_v27 = vld [vmem:[%s1037_s23 + $0x8] sm:$0xff]  ;;  %v271_v29 = vld [vmem:[%s1037_s23 + $0x10] sm:$0xff] }
  0x25   : > { %840 = vmatprep.subr.mxu1 %v279_v19  ;;  %821 = vmatpush3.msra.mxu0 %v772_v18  ;;  %v762_v24 = vld [vmem:[%s1037_s23 + $0x40] sm:$0xff]  ;;  %v765_v30 = vld [vmem:[%s1037_s23 + $0x58] sm:$0xff]  ;;  %v767_v34 = vld [vmem:[%s1037_s23 + $0x68] sm:$0xff] }
  0x26   : > { %841 = vmatpush3.msra.mxu1 %v279_v19  ;;  %822 = vmatprep.subr.mxu0 %v771_v20  ;;  %v269_v25 = vld [vmem:[%s1037_s23] sm:$0xff]  ;;  %v272_v31 = vld [vmem:[%s1037_s23 + $0x18] sm:$0xff]  ;;  %v274_v35 = vld [vmem:[%s1037_s23 + $0x28] sm:$0xff] }
  0x27   : > { %842 = vmatprep.subr.mxu1 %v278_v21  ;;  %823 = vmatpush3.msra.mxu0 %v771_v20  ;;  %v766_v32 = vld [vmem:[%s1037_s23 + $0x60] sm:$0xff]  ;;  %v768_v36 = vld [vmem:[%s1037_s23 + $0x70] sm:$0xff]  ;;  %v769_v38 = vld [vmem:[%s1037_s23 + $0x78] sm:$0xff] }
  0x28   : > { %843 = vmatpush3.msra.mxu1 %v278_v21  ;;  %824 = vmatprep.subr.mxu0 %v770_v22  ;;  %v273_v33 = vld [vmem:[%s1037_s23 + $0x20] sm:$0xff]  ;;  %v275_v37 = vld [vmem:[%s1037_s23 + $0x30] sm:$0xff]  ;;  %v276_v39 = vld [vmem:[%s1037_s23 + $0x38] sm:$0xff] }
  0x29   : > { %844 = vmatprep.subr.mxu1 %v277_v23  ;;  %825 = vmatpush3.msra.mxu0 %v770_v22  ;;  %v790_v42 = vld [vmem:[%s1145_s2] ss:$0 sm:$0xff] }
  0x2a   : > { %826 = vmatprep.mubr.msk.f32.mxu0 %vm295_vm0, %v762_v24  ;;  %845 = vmatpush3.msra.mxu1 %v277_v23 }
  0x2b   : > { %846 = vmatprep.mubr.msk.f32.mxu1 %vm295_vm0, %v269_v25  ;;  %827 = vmatmul.mubr.msk.f32.vlgmr.msra.gmra.mxu0 %vm295_vm0, %v763_v26 }
  0x2c   : > { %847 = vmatmul.mubr.msk.f32.vlgmr.msra.gmra.mxu1 %vm295_vm0, %v270_v27  ;;  %829 = vmatprep.mubr.msk.f32.mxu0 %vm295_vm0, %v764_v28 }
  0x2d   : > { %849 = vmatprep.mubr.msk.f32.mxu1 %vm295_vm0, %v271_v29 }
  0x2f   : > { %830 = vmatmul.mubr.msk.f32.gmra.mxu0 %vm295_vm0, %v765_v30 }
  0x30   : > { %850 = vmatmul.mubr.msk.f32.gmra.mxu1 %vm295_vm0, %v272_v31  ;;  %832 = vmatprep.mubr.msk.f32.mxu0 %vm295_vm0, %v766_v32 }
  0x31   : > { %852 = vmatprep.mubr.msk.f32.mxu1 %vm295_vm0, %v273_v33 }
  0x33   : > { %833 = vmatmul.mubr.msk.f32.gmra.mxu0 %vm295_vm0, %v767_v34 }
  0x34   : > { %853 = vmatmul.mubr.msk.f32.gmra.mxu1 %vm295_vm0, %v274_v35  ;;  %835 = vmatprep.mubr.msk.f32.mxu0 %vm295_vm0, %v768_v36 }
  0x35   : > { %855 = vmatprep.mubr.msk.f32.mxu1 %vm295_vm0, %v275_v37 }
  0x37   : > { %836 = vmatmul.mubr.msk.f32.gmra.mxu0 %vm295_vm0, %v769_v38 }
  0x38   : > { %856 = vmatmul.mubr.msk.f32.gmra.mxu1 %vm295_vm0, %v276_v39 }
  0xeb   : > { %v828_v40 = vpop.f32.mrf.mxu0 }
  0xec   : > { %v848_v41 = vpop.f32.mrf.mxu1 }
  0xed   : > { %v521_v43 = vadd.f32 %v848_v41, %v828_v40  ;;  %v386_v44 = vpop.f32.mrf.mxu0 }
  0xee   : > { %v515_v45 = vpop.f32.mrf.mxu1 }
  0xef   : > { %v516_v46 = vadd.f32 %v515_v45, %v386_v44  ;;  %v562_v47 = vadd.f32 %v790_v42, %v521_v43  ;;  %v831_v48 = vpop.f32.mrf.mxu0 }
  0xf0   : > { %v851_v49 = vpop.f32.mrf.mxu1 }
  0xf1   : > { %v531_v50 = vadd.f32 %v851_v49, %v831_v48  ;;  %v572_v51 = vsel %vm295_vm0, %v562_v47, -inf  ;;  %v561_v52 = vadd.f32 %v790_v42, %v516_v46  ;;  %v396_v53 = vpop.f32.mrf.mxu0 }
  0xf2   : > { %573 = vmax.xlane.f32.xlu0 %v572_v51  ;;  %v525_v54 = vpop.f32.mrf.mxu1 }
  0xf3   : > { %v526_v55 = vadd.f32 %v525_v54, %v396_v53  ;;  %v564_v56 = vadd.f32 %v790_v42, %v531_v50  ;;  %v834_v57 = vpop.f32.mrf.mxu0  ;;  %v569_v61 = vsel %vm295_vm0, %v561_v52, -inf }
  0xf4   : > { %v854_v58 = vpop.f32.mrf.mxu1 }
  0xf5   : > { %v541_v59 = vadd.f32 %v854_v58, %v834_v57  ;;  %v578_v60 = vsel %vm295_vm0, %v564_v56, -inf  ;;  %v563_v62 = vadd.f32 %v790_v42, %v526_v55  ;;  %v406_v63 = vpop.f32.mrf.mxu0 }
  0xf6   : > { %579 = vmax.xlane.f32.xlu1 %v578_v60  ;;  %v535_v0 = vpop.f32.mrf.mxu1  ;;  %570 = vmax.xlane.f32.xlu0 %v569_v61 }
  0xf7   : > { %v536_v1 = vadd.f32 %v535_v0, %v406_v63  ;;  %v837_v2 = vpop.f32.mrf.mxu0  ;;  %v575_v5 = vsel %vm295_vm0, %v563_v62, -inf  ;;  %v566_v7 = vadd.f32 %v790_v42, %v541_v59 }
  0xf8   : > { %v857_v3 = vpop.f32.mrf.mxu1 }
  0xf9   : > { %v551_v4 = vadd.f32 %v857_v3, %v837_v2  ;;  %v565_v6 = vadd.f32 %v790_v42, %v536_v1  ;;  %v416_v8 = vpop.f32.mrf.mxu0  ;;  %v584_v12 = vsel %vm295_vm0, %v566_v7, -inf }
  0xfa   : > { %v545_v9 = vpop.f32.mrf.mxu1  ;;  %576 = vmax.xlane.f32.xlu1 %v575_v5 }
  0xfb   : > { %v546_v10 = vadd.f32 %v545_v9, %v416_v8  ;;  %v581_v11 = vsel %vm295_vm0, %v565_v6, -inf  ;;  %v568_v14 = vadd.f32 %v790_v42, %v551_v4 }
  0xfc   : > { %582 = vmax.xlane.f32.xlu0 %v581_v11 }
  0xfd   : > { %v567_v13 = vadd.f32 %v790_v42, %v546_v10  ;;  %v590_v16 = vsel %vm295_vm0, %v568_v14, -inf }
  0xfe   : > { %585 = vmax.xlane.f32.xlu1 %v584_v12 }
  0xff   : > { %v587_v15 = vsel %vm295_vm0, %v567_v13, -inf }
 0x100   : > { %588 = vmax.xlane.f32.xlu0 %v587_v15 }
 0x102   : > { %591 = vmax.xlane.f32.xlu1 %v590_v16 }
 0x17b   : > { %v574_v17 = vpop.xlane.xlu0 %573 }
 0x17c   : > { %v594_v18 = vsub.f32 %v562_v47, %v574_v17 }
 0x17e   : > { %v603_v19 = vmul.f32 1.442695, %v594_v18 }
 0x17f   : > { %v580_v20 = vpop.xlane.xlu1 %579  ;;  %v571_v21 = vpop.xlane.xlu0 %570 }
 0x180   : > { %882 = vpow2.f32 %v603_v19  ;;  %v596_v22 = vsub.f32 %v564_v56, %v580_v20  ;;  %v593_v23 = vsub.f32 %v561_v52, %v571_v21 }
 0x182   : > { %v607_v24 = vmul.f32 1.442695, %v596_v22  ;;  %v601_v25 = vmul.f32 1.442695, %v593_v23 }
 0x183   : > { %v577_v26 = vpop.xlane.xlu1 %576 }
 0x184   : > { %884 = vpow2.f32 %v607_v24  ;;  %v595_v27 = vsub.f32 %v563_v62, %v577_v26 }
 0x185   : > { %886 = vpow2.f32 %v601_v25  ;;  %v583_v28 = vpop.xlane.xlu0 %582 }
 0x186   : > { %v605_v29 = vmul.f32 1.442695, %v595_v27  ;;  %v597_v30 = vsub.f32 %v565_v6, %v583_v28 }
 0x187   : > { %v586_v31 = vpop.xlane.xlu1 %585 }
 0x188   : > { %888 = vpow2.f32 %v605_v29  ;;  %v609_v32 = vmul.f32 1.442695, %v597_v30  ;;  %v598_v33 = vsub.f32 %v566_v7, %v586_v31 }
 0x189   : > { %v589_v34 = vpop.xlane.xlu0 %588 }
 0x18a   : > { %v611_v35 = vmul.f32 1.442695, %v598_v33  ;;  %v599_v36 = vsub.f32 %v567_v13, %v589_v34  ;;  %890 = vpow2.f32 %v609_v32 }
 0x18b   : > { %v592_v37 = vpop.xlane.xlu1 %591 }
 0x18c   : > { %892 = vpow2.f32 %v611_v35  ;;  %v613_v38 = vmul.f32 1.442695, %v599_v36  ;;  %v600_v39 = vsub.f32 %v568_v14, %v592_v37 }
 0x18d   : > { %v883_v40 = vpop.eup %882 }
 0x18e   : > { %v615_v41 = vmul.f32 1.442695, %v600_v39  ;;  %v620_v42 = vsel %vm295_vm0, %v883_v40, 0.0  ;;  %894 = vpow2.f32 %v613_v38 }
 0x18f   : > { %621 = vadd.xlane.f32.xlu1 %v620_v42 }
 0x190   : > { %896 = vpow2.f32 %v615_v41 }
 0x191   : > { %v885_v43 = vpop.eup %884 }
 0x192   : > { %v887_v44 = vpop.eup %886  ;;  %v626_v45 = vsel %vm295_vm0, %v885_v43, 0.0 }
 0x193   : > { %627 = vadd.xlane.f32.xlu1 %v626_v45  ;;  %v617_v46 = vsel %vm295_vm0, %v887_v44, 0.0 }
 0x194   : > { %618 = vadd.xlane.f32.xlu0 %v617_v46 }
 0x195   : > { %v1085_v47 = vpop.eup %888 }
 0x196   : > { %v623_v48 = vsel %vm295_vm0, %v1085_v47, 0.0 }
 0x197   : > { %v1089_v49 = vpop.eup %890 }
 0x198   : > { %624 = vadd.xlane.f32.xlu0 %v623_v48  ;;  %v629_v52 = vsel %vm295_vm0, %v1089_v49, 0.0 }
 0x199   : > { %v1091_v50 = vpop.eup %892 }
 0x19a   : > { %v632_v51 = vsel %vm295_vm0, %v1091_v50, 0.0 }
 0x19b   : > { %633 = vadd.xlane.f32.xlu1 %v632_v51  ;;  %v1097_v53 = vpop.eup %894 }
 0x19c   : > { %630 = vadd.xlane.f32.xlu0 %v629_v52  ;;  %v635_v56 = vsel %vm295_vm0, %v1097_v53, 0.0 }
 0x19d   : > { %v1099_v54 = vpop.eup %896 }
 0x19e   : > { %v638_v55 = vsel %vm295_vm0, %v1099_v54, 0.0 }
 0x19f   : > { %639 = vadd.xlane.f32.xlu1 %v638_v55 }
 0x1a0   : > { %636 = vadd.xlane.f32.xlu0 %v635_v56 }
 0x218   : > { %v622_v57 = vpop.xlane.xlu1 %621 }
 0x219   : > { %898 = vrcp.f32 %v622_v57 }
 0x21c   : > { %v628_v58 = vpop.xlane.xlu1 %627 }
 0x21d   : > { %900 = vrcp.f32 %v628_v58  ;;  %v619_v59 = vpop.xlane.xlu0 %618 }
 0x21e   : > { %902 = vrcp.f32 %v619_v59 }
 0x221   : > { %v625_v60 = vpop.xlane.xlu0 %624 }
 0x222   : > { %904 = vrcp.f32 %v625_v60 }
 0x224   : > { %v634_v61 = vpop.xlane.xlu1 %633 }
 0x225   : > { %906 = vrcp.f32 %v634_v61  ;;  %v631_v62 = vpop.xlane.xlu0 %630 }
 0x226   : > { %v899_v63 = vpop.eup %898  ;;  %908 = vrcp.f32 %v631_v62 }
 0x227   : > { %v650_v0 = vmul.f32 %v899_v63, %v622_v57 }
 0x228   : > { %v640_v1 = vpop.xlane.xlu1 %639 }
 0x229   : > { %v658_v2 = vsub.f32 2.0, %v650_v0  ;;  %910 = vrcp.f32 %v640_v1  ;;  %v637_v3 = vpop.xlane.xlu0 %636 }
 0x22a   : > { %v901_v4 = vpop.eup %900  ;;  %912 = vrcp.f32 %v637_v3 }
 0x22b   : > { %v903_v5 = vpop.eup %902  ;;  %v666_v6 = vmul.f32 %v899_v63, %v658_v2  ;;  %v652_v7 = vmul.f32 %v901_v4, %v628_v58 }
 0x22c   : > { %v649_v8 = vmul.f32 %v903_v5, %v619_v59 }
 0x22d   : > { %v674_v9 = vmul.f32 %v883_v40, %v666_v6  ;;  %v660_v10 = vsub.f32 2.0, %v652_v7 }
 0x22e   : > { %v657_v11 = vsub.f32 2.0, %v649_v8 }
 0x22f   : > { %v905_v12 = vpop.eup %904  ;;  %682 = vst.msk [vmem:[%s1110_s28 + $0x8] sm:$0xff] %vm295_vm0, %v674_v9  ;;  %v668_v13 = vmul.f32 %v901_v4, %v660_v10 }
 0x230   : > { %v665_v14 = vmul.f32 %v903_v5, %v657_v11  ;;  %v651_v15 = vmul.f32 %v905_v12, %v625_v60 }
 0x231   : > { %v676_v16 = vmul.f32 %v885_v43, %v668_v13 }
 0x232   : > { %v907_v17 = vpop.eup %906  ;;  %v673_v18 = vmul.f32 %v887_v44, %v665_v14  ;;  %v659_v19 = vsub.f32 2.0, %v651_v15 }
 0x233   : > { %v909_v20 = vpop.eup %908  ;;  %684 = vst.msk [vmem:[%s1110_s28 + $0x18] sm:$0xff] %vm295_vm0, %v676_v16  ;;  %v654_v21 = vmul.f32 %v907_v17, %v634_v61 }
 0x234   : > { %681 = vst.msk [vmem:[%s1110_s28] sm:$0xff] %vm295_vm0, %v673_v18  ;;  %v667_v22 = vmul.f32 %v905_v12, %v659_v19  ;;  %v653_v23 = vmul.f32 %v909_v20, %v631_v62 }
 0x235   : > { %v662_v24 = vsub.f32 2.0, %v654_v21 }
 0x236   : > { %v911_v25 = vpop.eup %910  ;;  %v675_v26 = vmul.f32 %v1085_v47, %v667_v22  ;;  %v661_v27 = vsub.f32 2.0, %v653_v23 }
 0x237   : > { %v913_v28 = vpop.eup %912  ;;  %v670_v29 = vmul.f32 %v907_v17, %v662_v24  ;;  %v656_v30 = vmul.f32 %v911_v25, %v640_v1 }
 0x238   : > { %683 = vst.msk [vmem:[%s1110_s28 + $0x10] sm:$0xff] %vm295_vm0, %v675_v26  ;;  %v669_v31 = vmul.f32 %v909_v20, %v661_v27  ;;  %v655_v32 = vmul.f32 %v913_v28, %v637_v3 }
 0x239   : > { %v678_v33 = vmul.f32 %v1091_v50, %v670_v29  ;;  %v664_v34 = vsub.f32 2.0, %v656_v30 }
 0x23a   : > { %v677_v35 = vmul.f32 %v1089_v49, %v669_v31  ;;  %v663_v36 = vsub.f32 2.0, %v655_v32 }
 0x23b   : > { %686 = vst.msk [vmem:[%s1110_s28 + $0x28] sm:$0xff] %vm295_vm0, %v678_v33  ;;  %v672_v37 = vmul.f32 %v911_v25, %v664_v34 }
 0x23c   : > { %685 = vst.msk [vmem:[%s1110_s28 + $0x20] sm:$0xff] %vm295_vm0, %v677_v35  ;;  %v671_v38 = vmul.f32 %v913_v28, %v663_v36 }
 0x23d   : > { %v680_v39 = vmul.f32 %v1099_v54, %v672_v37 }
 0x23e   : > { %v679_v40 = vmul.f32 %v1097_v53, %v671_v38 }
 0x23f   : > { %688 = vst.msk [vmem:[%s1110_s28 + $0x38] sm:$0xff] %vm295_vm0, %v680_v39 }
 0x240   : > { %687 = vst.msk [vmem:[%s1110_s28 + $0x30] sm:$0xff] %vm295_vm0, %v679_v40 }
 0x241 PF: > { %p10_p9 = scmp.ge.s32.totalorder %s975_s16, 6   ;;  %s1147_s12 = smov %s932_s13 }
 0x242   : > { %s1148_s13 = smov %s984_s19  ;;  %s1149_s14 = smov %s975_s16 }
 0x243   :  { %12 = sbr.rel (!%p10_p9) target bundleno = 2 (0x2), region = 107 }

</bundles_post_ra>
